<compile_context>
chip_gen: v7x
topology: tpu7x:2x2x1
jax: 0.10.0
libtpu: 0.0.40
codegen_flags: <defaults>
</compile_context>

<pallas_src>
import functools

import jax
import jax.numpy as jnp
from jax.experimental import pallas as pl
from jax.experimental.pallas import tpu as pltpu

LRELU_SLOPE = 0.1


def get_padding(kernel_size, dilation=1):
    return int((kernel_size * dilation - dilation) / 2)


def _round_up(x, m):
    return ((x + m - 1) // m) * m


def _vmem_capacity_bytes():
    try:
        info = pltpu.get_tpu_info()
        cap = getattr(info, "vmem_capacity_bytes", None)
        if cap:
            return int(cap)
    except Exception:
        pass
    return 64 * 1024 * 1024  # conservative (v7x-sized VMEM)


_VMEM_CAP = _vmem_capacity_bytes()
_BIG_VMEM = _VMEM_CAP > 96 * 1024 * 1024          # v5e/v6e (128 MiB) vs v7x (64 MiB)
_TCO_CAP = 1024 if _BIG_VMEM else 512             # Cout=1024 layers: n_co=1 (big) or 2
_TM_CAP = 1024 if _BIG_VMEM else 512
_VMEM_LIMIT = (96 if _BIG_VMEM else 44) * 1024 * 1024


# ----------------------- Kernel 1: fused GEMM (stride=3 layers) -----------------------

def _matmul_bias_lrelu_kernel(x_ref, w_ref, b_ref, o_ref, *, apply_act):
    # x_ref: (tm, Kc)  bf16  -- one M tile of the im2col'd activations
    # w_ref: (Kc, tco) bf16  -- weight tile, resident across the inner m grid axis
    # b_ref: (1, tco)  f32
    # o_ref: (tm, tco) bf16/f32
    acc = jnp.dot(x_ref[...], w_ref[...], preferred_element_type=jnp.float32)
    y = acc + b_ref[...]
    if apply_act:
        y = jnp.where(y >= 0, y, LRELU_SLOPE * y)
    o_ref[...] = y.astype(o_ref.dtype)


def conv_layer_gemm(x, w, bias, *, stride, pad, apply_act, out_dtype):
    """Conv along H only ((K,1) Conv2d folded to 1D), fused bias + leaky-relu.

    x: (N, H, Cin) (cast to bf16 before im2col), w: (K, Cin, Cout) f32,
    bias: (Cout,) f32 -> (N, H_out, Cout) out_dtype.
    """
    N, H, Cin = x.shape
    K, _, Cout = w.shape
    H_out = (H + 2 * pad - K) // stride + 1

    # bf16 BEFORE pad/taps so the expanded im2col never exists in f32.
    xb = x.astype(jnp.bfloat16)
    xp = jnp.pad(xb, ((0, 0), (pad, pad), (0, 0)))
    taps = [xp[:, k:k + stride * (H_out - 1) + 1:stride, :] for k in range(K)]
    xcol = jnp.stack(taps, axis=2).reshape(N * H_out, K * Cin)   # (M, Kc) bf16
    wcol = w.reshape(K * Cin, Cout).astype(jnp.bfloat16)         # (Kc, Cout)

    M, Kc = xcol.shape

    # lane-dense Cout; Cout tile sized so activations are streamed at most 1-2 times
    Cout_p = _round_up(Cout, 128)
    tco = min(Cout_p, _TCO_CAP)
    tm = min(_TM_CAP, _round_up(M, 8))
    M_p = _round_up(M, tm)

    xcol = jnp.pad(xcol, ((0, M_p - M), (0, 0)))
    wcol = jnp.pad(wcol, ((0, 0), (0, Cout_p - Cout)))
    bias2 = jnp.pad(bias, (0, Cout_p - Cout)).reshape(1, Cout_p).astype(jnp.float32)

    n_co = Cout_p // tco
    n_m = M_p // tm
    kernel = functools.partial(_matmul_bias_lrelu_kernel, apply_act=apply_act)

    if n_co == 1:
        # single Cout tile: 1-D grid over M so megacore (v7x) shards the big axis
        grid = (n_m,)
        in_specs = [
            pl.BlockSpec((tm, Kc), lambda m: (m, 0)),
            pl.BlockSpec((Kc, tco), lambda m: (0, 0)),
            pl.BlockSpec((1, tco), lambda m: (0, 0)),
        ]
        out_specs = pl.BlockSpec((tm, tco), lambda m: (m, 0))
        dim_sem = ("parallel",)
    else:
        # co OUTER, m INNER: weight tile constant over inner axis -> stays VMEM-resident
        grid = (n_co, n_m)
        in_specs = [
            pl.BlockSpec((tm, Kc), lambda co, m: (m, 0)),
            pl.BlockSpec((Kc, tco), lambda co, m: (0, co)),
            pl.BlockSpec((1, tco), lambda co, m: (0, co)),
        ]
        out_specs = pl.BlockSpec((tm, tco), lambda co, m: (m, co))
        dim_sem = ("parallel", "parallel")

    y = pl.pallas_call(
        kernel,
        out_shape=jax.ShapeDtypeStruct((M_p, Cout_p), out_dtype),
        grid=grid,
        in_specs=in_specs,
        out_specs=out_specs,
        compiler_params=pltpu.CompilerParams(
            dimension_semantics=dim_sem,
            vmem_limit_bytes=_VMEM_LIMIT,
        ),
    )(xcol, wcol, bias2)

    return y[:M, :Cout].reshape(N, H_out, Cout)


# -------------- Kernel 2: stride=1 conv, K taps fused in-kernel (no im2col) -----------

def _conv_s1_kernel(x_ref, w_ref, b_ref, o_ref, *, K, H_out, apply_act):
    # x_ref: (tn, Hp, Cin) bf16  -- padded, UN-expanded activation block
    # w_ref: (K, Cin, tco) bf16  -- resident across the inner n grid axis
    # b_ref: (1, tco)      f32
    # o_ref: (tn, H_out, tco)
    tn = o_ref.shape[0]
    tco = o_ref.shape[2]
    bias = b_ref[...]
    w_taps = [w_ref[k] for k in range(K)]            # K x (Cin, tco)
    for n in range(tn):
        xn = x_ref[n]                                 # (Hp, Cin)
        acc = jnp.zeros((H_out, tco), jnp.float32)
        for k in range(K):
            acc = acc + jnp.dot(xn[k:k + H_out, :], w_taps[k],
                                preferred_element_type=jnp.float32)
        y = acc + bias
        if apply_act:
            y = jnp.where(y >= 0, y, LRELU_SLOPE * y)
        o_ref[n] = y.astype(o_ref.dtype)


def conv_layer_s1(x, w, bias, *, pad, apply_act, out_dtype):
    """stride=1 conv over H with the K taps fused in-kernel (no im2col expansion).

    x: (N, H, Cin), w: (K, Cin, Cout) f32, bias: (Cout,) f32 -> (N, H_out, Cout).
    """
    N, H, Cin = x.shape
    K, _, Cout = w.shape
    Hp = H + 2 * pad
    H_out = Hp - K + 1

    # Degenerate huge-H safety valve: fall back to the tiled GEMM path.
    if Hp * Cin * 2 > 8 * 1024 * 1024:
        return conv_layer_gemm(x, w, bias, stride=1, pad=pad,
                               apply_act=apply_act, out_dtype=out_dtype)

    xp = jnp.pad(x.astype(jnp.bfloat16), ((0, 0), (pad, pad), (0, 0)))
    wk = w.astype(jnp.bfloat16)

    Cout_p = _round_up(Cout, 128)
    tco = min(Cout_p, _TCO_CAP)
    row_budget = 2048                                  # sublane rows per x block
    tn = max(1, min(N, row_budget // max(Hp, 1)))
    N_p = _round_up(N, tn)

    xp = jnp.pad(xp, ((0, N_p - N), (0, 0), (0, 0)))
    wk = jnp.pad(wk, ((0, 0), (0, 0), (0, Cout_p - Cout)))
    bias2 = jnp.pad(bias, (0, Cout_p - Cout)).reshape(1, Cout_p).astype(jnp.float32)

    n_co = Cout_p // tco
    n_n = N_p // tn
    kernel = functools.partial(_conv_s1_kernel, K=K, H_out=H_out, apply_act=apply_act)

    if n_co == 1:
        grid = (n_n,)
        in_specs = [
            pl.BlockSpec((tn, Hp, Cin), lambda n: (n, 0, 0)),
            pl.BlockSpec((K, Cin, tco), lambda n: (0, 0, 0)),
            pl.BlockSpec((1, tco), lambda n: (0, 0)),
        ]
        out_specs = pl.BlockSpec((tn, H_out, tco), lambda n: (n, 0, 0))
        dim_sem = ("parallel",)
    else:
        grid = (n_co, n_n)
        in_specs = [
            pl.BlockSpec((tn, Hp, Cin), lambda co, n: (n, 0, 0)),
            pl.BlockSpec((K, Cin, tco), lambda co, n: (0, 0, co)),
            pl.BlockSpec((1, tco), lambda co, n: (0, co)),
        ]
        out_specs = pl.BlockSpec((tn, H_out, tco), lambda co, n: (n, 0, co))
        dim_sem = ("parallel", "parallel")

    y = pl.pallas_call(
        kernel,
        out_shape=jax.ShapeDtypeStruct((N_p, H_out, Cout_p), out_dtype),
        grid=grid,
        in_specs=in_specs,
        out_specs=out_specs,
        compiler_params=pltpu.CompilerParams(
            dimension_semantics=dim_sem,
            vmem_limit_bytes=_VMEM_LIMIT,
        ),
    )(xp, wk, bias2)

    return y[:N, :, :Cout]


# ------------------------------------- Forward ----------------------------------------

def discriminator_p_forward(x, params, period, kernel_size=5, stride=3):
    """x: (B, 1, T) float32.  Returns (flattened_logits, fmap) like the torch module
    (fmap tensors are returned in NCHW (B, C, H, W), f32)."""
    b, c, t = x.shape
    if t % period != 0:
        n_pad = period - t % period
        x = jnp.pad(x, ((0, 0), (0, 0), (0, n_pad)), mode="reflect")
        t = t + n_pad
    h = t // period
    x4 = x.reshape(b, c, h, period)                               # NCHW (B,1,H,W)
    # fold period (W) into batch, channels last, bf16 MXU feed: (B*W, H, C)
    xk = jnp.transpose(x4, (0, 3, 2, 1)).reshape(b * period, h, c).astype(jnp.bfloat16)

    fmaps_k = []
    pad = get_padding(kernel_size, 1)
    for i, (w, bb) in enumerate(params["convs"]):
        if i < 4:   # stride-3 layers -> im2col GEMM kernel
            xk = conv_layer_gemm(xk, w, bb, stride=stride, pad=pad,
                                 apply_act=True, out_dtype=jnp.bfloat16)
        else:       # stride-1 1024ch layer -> K-tap-fused kernel (no im2col blow-up)
            xk = conv_layer_s1(xk, w, bb, pad=pad, apply_act=True,
                               out_dtype=jnp.bfloat16)
        fmaps_k.append(xk)

    w, bb = params["conv_post"]
    xk = conv_layer_s1(xk, w, bb, pad=1, apply_act=False, out_dtype=jnp.float32)
    fmaps_k.append(xk)

    def to_nchw(a):
        n, hh, cc = a.shape
        # transpose in storage dtype (bf16 for intermediates), upcast to f32 at the end
        return jnp.transpose(a.reshape(b, period, hh, cc), (0, 3, 2, 1)).astype(jnp.float32)

    fmap = [to_nchw(a) for a in fmaps_k]
    out = fmap[-1].reshape(b, -1)                                 # torch.flatten(x, 1, -1)
    return out, fmap


# ------------------------------------ Param init ---------------------------------------

def init_params(key, kernel_size=5):
    # weights stored as (K, Cin, Cout); bias as (Cout,)
    cfgs = [(1, 32), (32, 128), (128, 512), (512, 1024), (1024, 1024)]
    params = {"convs": [], "conv_post": None}
    for (ci, co) in cfgs:
        key, k1, k2 = jax.random.split(key, 3)
        scale = 1.0 / (ci * kernel_size) ** 0.5
        w = jax.random.normal(k1, (kernel_size, ci, co), jnp.float32) * scale
        bb = jax.random.normal(k2, (co,), jnp.float32) * 0.01
        params["convs"].append((w, bb))
    key, k1, k2 = jax.random.split(key, 3)
    w = jax.random.normal(k1, (3, 1024, 1), jnp.float32) * (1.0 / (1024 * 3) ** 0.5)
    bb = jax.random.normal(k2, (1,), jnp.float32) * 0.01
    params["conv_post"] = (w, bb)
    return params


if __name__ == "__main__":
    key = jax.random.PRNGKey(0)
    pkey, xkey = jax.random.split(key)
    params = init_params(pkey)

    # small shapes: batch=2, channels=1 (module requires C=1), seq T=64, period=3
    x = jax.random.normal(xkey, (2, 1, 64), jnp.float32)

    out, fmap = discriminator_p_forward(x, params, period=3)
    out = jax.block_until_ready(out)
    for f in fmap:
        jax.block_until_ready(f)

    assert out.shape[0] == 2 and out.ndim == 2
    assert len(fmap) == 6
    assert all(f.dtype == jnp.float32 for f in fmap)
    assert bool(jnp.all(jnp.isfinite(out)))
    print("KERNEL_OK")
</pallas_src>

<mosaic_0001>
module attributes {stable_mosaic.version = 11 : i64} {
  func.func @_matmul_bias_lrelu_kernel(%arg0: i32, %arg1: memref<48x5xbf16, #tpu.memory_space<vmem>>, %arg2: memref<5x128xbf16, #tpu.memory_space<vmem>>, %arg3: memref<1x128xf32, #tpu.memory_space<vmem>>, %arg4: memref<48x128xbf16, #tpu.memory_space<vmem>>) attributes {dimension_semantics = [#tpu.dimension_semantics<parallel>], iteration_bounds = array<i64: 1>, scalar_prefetch = 0 : i64, scratch_operands = 0 : i64, tpu.core_type = #tpu.core_type<tc>, window_params = [{transform_indices = @transform_0, window_bounds = array<i64: 48, 5>}, {pipeline_mode = #tpu.pipeline_mode<synchronous>, transform_indices = @transform_1, window_bounds = array<i64: 5, 128>}, {pipeline_mode = #tpu.pipeline_mode<synchronous>, transform_indices = @transform_2, window_bounds = array<i64: 1, 128>}, {transform_indices = @transform_3, window_bounds = array<i64: 48, 128>}]} {
    %c0 = arith.constant 0 : index
    %c0_0 = arith.constant 0 : index
    %0 = vector.load %arg1[%c0, %c0_0] : memref<48x5xbf16, #tpu.memory_space<vmem>>, vector<48x5xbf16>
    %c0_1 = arith.constant 0 : index
    %c0_2 = arith.constant 0 : index
    %1 = vector.load %arg2[%c0_1, %c0_2] : memref<5x128xbf16, #tpu.memory_space<vmem>>, vector<5x128xbf16>
    %cst = arith.constant dense<0.000000e+00> : vector<48x128xf32>
    %2 = tpu.matmul %0, %1, %cst {dimension_numbers = #tpu.dot_dimension_numbers<[1], [0], [0], [1], [0, 0, 1, 1], [], []>} : vector<48x5xbf16>, vector<5x128xbf16>, vector<48x128xf32> -> vector<48x128xf32>
    %c0_3 = arith.constant 0 : index
    %c0_4 = arith.constant 0 : index
    %3 = vector.load %arg3[%c0_3, %c0_4] : memref<1x128xf32, #tpu.memory_space<vmem>>, vector<1x128xf32>
    %4 = vector.broadcast %3 : vector<1x128xf32> to vector<48x128xf32>
    %5 = arith.addf %2, %4 : vector<48x128xf32>
    %cst_5 = arith.constant 0.000000e+00 : f32
    %6 = vector.broadcast %cst_5 : f32 to vector<48x128xf32>
    %7 = arith.cmpf oge, %5, %6 : vector<48x128xf32>
    %cst_6 = arith.constant 1.000000e-01 : f32
    %8 = vector.broadcast %cst_6 : f32 to vector<48x128xf32>
    %9 = arith.mulf %8, %5 : vector<48x128xf32>
    %10 = arith.select %7, %5, %9 : vector<48x128xi1>, vector<48x128xf32>
    %11 = arith.truncf %10 : vector<48x128xf32> to vector<48x128xbf16>
    %c0_7 = arith.constant 0 : index
    %c0_8 = arith.constant 0 : index
    %12 = vector.load %arg4[%c0_7, %c0_8] : memref<48x128xbf16, #tpu.memory_space<vmem>>, vector<48x128xbf16>
    tpu.vector_store %arg4[%c0_7, %c0_8], %11 {strides = array<i32>} : memref<48x128xbf16, #tpu.memory_space<vmem>>, vector<48x128xbf16>,
    return
  }
  func.func @transform_0(%arg0: i32) -> (i32, i32) {
    %c0_i32 = arith.constant 0 : i32
    %c0_i32_0 = arith.constant 0 : i32
    return %arg0, %c0_i32 : i32, i32
  }
  func.func @transform_1(%arg0: i32) -> (i32, i32) {
    %c0_i32 = arith.constant 0 : i32
    %c0_i32_0 = arith.constant 0 : i32
    %c0_i32_1 = arith.constant 0 : i32
    return %c0_i32, %c0_i32_0 : i32, i32
  }
  func.func @transform_2(%arg0: i32) -> (i32, i32) {
    %c0_i32 = arith.constant 0 : i32
    %c0_i32_0 = arith.constant 0 : i32
    %c0_i32_1 = arith.constant 0 : i32
    return %c0_i32, %c0_i32_0 : i32, i32
  }
  func.func @transform_3(%arg0: i32) -> (i32, i32) {
    %c0_i32 = arith.constant 0 : i32
    %c0_i32_0 = arith.constant 0 : i32
    return %arg0, %c0_i32 : i32, i32
  }
}

</mosaic_0001>

<bundles_post_ra>
// kernel: tpu_custom_call.1
= control target key start
LH: loop header
LB: loop body
LE: loop exit
PB: predicated region body
PF: predicated region fallthrough
CT: control target
= control target key end

     0   :  { %vm55_vm0 = vcmask 1041408   ;;  %vm56_vm1 = vcmask 1042432   ;;  %v272_v1 = vmov 0.0   ;;  %v273_v2 = vmov 65535   ;;  %s325_s0 = inlined_call_operand.vmem [shape: bf16[48,5], index: 0, kind: input, shape index: {}]   ;;  %s326_s1 = inlined_call_operand.vmem [shape: bf16[5,128], index: 1, kind: input, shape index: {}]   ;;  %s327_s2 = inlined_call_operand.vmem [shape: f32[1,128], index: 2, kind: input, shape index: {}]   ;;  %s328_s3 = inlined_call_operand.hbm [shape: bf16[48,128], index: 3, kind: output, shape index: {}]  }
   0x1   :  { %v22_v0 = vld [vmem:[%s326_s1] sm:$0x7]  ;;  %237 = vmatprep.subr.bf16.mxu1 %v272_v1  ;;  %v57_v3 = vsel %vm55_vm0, 4294967295, %v273_v2  ;;  %223 = vmatprep.subr.bf16.mxu0 %v272_v1  ;;  %vm274_vm2 = vmmov 0   ;;  %v245_v6 = vld [vmem:[%s325_s0 + $0x8] sm:$0xff]  }
   0x2   :  { %v58_v4 = vsel %vm56_vm1, %v57_v3, 0  ;;  %229 = vmatprep.mubr.msk.bf16.mxu1 %vm274_vm2, %v272_v1  ;;  %225 = vmatprep.mubr.msk.bf16.mxu0 %vm274_vm2, %v272_v1  ;;  %v246_v7 = vld [vmem:[%s325_s0] sm:$0xff]  }
   0x3   :  { %v60_v5 = vand.u32 %v58_v4, %v22_v0 }
   0x4   :  { %8 = vsyncpa [#allocation3], 0  ;;  %vm45_vm3 = vcmask 39936   ;;  %v247_v8 = vld [vmem:[%s325_s0 + $0x10] sm:$0xff]   ;;  %v183_v9 = vld [vmem:[%s327_s2] ss:$0 sm:$0xff] }
   0x5   :  { %238 = vmatpush3.bf16.msra.mxu1 %v60_v5  ;;  %224 = vmatpush3.bf16.msra.mxu0 %v60_v5  ;;  %s275_s0 = smov [#allocation2]  }
   0x6   :  { %s172_s2 = sshll.u32 %s275_s0, 4  ;;  %s173_s2 = int_to_ptr.vmem [resolvable:$true] %s172_s2 }
   0x7   :  { %s248_s21 = scalar_lea.vmem %s173_s2, 384  ;;  %p253_p1 = scmp.lt.s32.totalorder %s173_s2, %s173_s2 }
   0x8   :  { %230 = vmatmul.mubr.msk.bf16.vlgmr.msra.gmra.mrb[0].mxu1 %vm45_vm3, %v245_v6  ;;  %226 = vmatmul.mubr.msk.bf16.vlgmr.msra.gmra.mrb[0].mxu0 %vm45_vm3, %v246_v7  ;;  %p249_p0 = scmp.ne.s32.totalorder %s173_s2, %s248_s21  ;;  %p254_p2 = scmp.lt.s32.totalorder %s248_s21, %s248_s21 }
   0x9   :  { %233 = vmatprep.mubr.msk.bf16.mxu1 %vm274_vm2, %v272_v1 }
   0xa   :  { %p255_p3 = por %p254_p2, %p253_p1 }
   0xc   :  { %p256_p4 = pnand %p255_p3, %p249_p0 }
  0x10   :  { %234 = vmatmul.mubr.msk.bf16.gmra.mrb[4].mxu1 %vm45_vm3, %v247_v8 }
  0xdb   :  { %v104_v10 = vpop.f32.mrb[0].mxu1  ;;  %v96_v11 = vpop.f32.mrb[0].mxu0 }
  0xdc   :  { %v105_v12 = vadd.f32 %v183_v9, %v104_v10  ;;  %v231_v13 = vpop.f32.mrb[1].mxu1  ;;  %v97_v14 = vadd.f32 %v183_v9, %v96_v11  ;;  %v227_v15 = vpop.f32.mrb[1].mxu0 }
  0xdd   :  { %v107_v16 = vpop.f32.mrb[2].mxu1  ;;  %v99_v17 = vpop.f32.mrb[2].mxu0 }
  0xde   :  { %v127_v18 = vmul.f32 0.1, %v105_v12  ;;  %v108_v19 = vadd.f32 %v183_v9, %v107_v16  ;;  %v232_v20 = vpop.f32.mrb[3].mxu1  ;;  %vm119_vm4 = vcmp.ge.f32.partialorder %v97_v14, 0.0  ;;  %v228_v21 = vpop.f32.mrb[3].mxu0  ;;  %vm121_vm5 = vcmp.ge.f32.partialorder %v105_v12, 0.0 }
  0xdf   :  { %v125_v22 = vmul.f32 0.1, %v97_v14  ;;  %v100_v23 = vadd.f32 %v183_v9, %v99_v17 }
  0xe0   :  { %vm122_vm6 = vcmp.ge.f32.partialorder %v108_v19, 0.0  ;;  %v128_v24 = vmul.f32 0.1, %v108_v19  ;;  %v133_v27 = vsel %vm121_vm5, %v105_v12, %v127_v18 }
  0xe1   :  { %v131_v25 = vsel %vm119_vm4, %v97_v14, %v125_v22  ;;  %vm120_vm7 = vcmp.ge.f32.partialorder %v100_v23, 0.0  ;;  %v126_v26 = vmul.f32 0.1, %v100_v23 }
  0xe2   :  { %v134_v28 = vsel %vm122_vm6, %v108_v19, %v128_v24 }
  0xe3   :  { %v210_v29 = vpack.c.bf16 %v134_v28, %v133_v27  ;;  %v132_v30 = vsel %vm120_vm7, %v100_v23, %v126_v26  ;;  %v112_v31 = vpop.f32.mrb[4].mxu1 }
  0xe4   :  { %v205_v32 = vpack.c.bf16 %v132_v30, %v131_v25  ;;  %v113_v33 = vadd.f32 %v183_v9, %v112_v31  ;;  %v235_v34 = vpop.f32.mrb[5].mxu1 }
  0xe5   :  { %217 = vst [vmem:[#allocation2 + $0x8] sm:$0xff] %v210_v29   ;;  %v115_v35 = vpop.f32.mrb[6].mxu1 }
  0xe6   :  { %206 = vst [vmem:[#allocation2] sm:$0xff] %v205_v32   ;;  %v129_v36 = vmul.f32 0.1, %v113_v33  ;;  %v116_v37 = vadd.f32 %v183_v9, %v115_v35  ;;  %v236_v38 = vpop.f32.mrb[7].mxu1  ;;  %vm123_vm8 = vcmp.ge.f32.partialorder %v113_v33, 0.0 }
  0xe8   :  { %vm124_vm9 = vcmp.ge.f32.partialorder %v116_v37, 0.0  ;;  %v130_v39 = vmul.f32 0.1, %v116_v37  ;;  %v135_v40 = vsel %vm123_vm8, %v113_v33, %v129_v36 }
  0xea   :  { %v136_v41 = vsel %vm124_vm9, %v116_v37, %v130_v39 }
  0xeb   :  { %v215_v42 = vpack.c.bf16 %v136_v41, %v135_v40 }
  0xed   :  { %218 = vst [vmem:[#allocation2 + $0x10] sm:$0xff] %v215_v42  }
  0xee   :  { %259 = shalt.err (!%p256_p4)
}
  0xef   :  { %s260_s24 = scalar_lea.hbm %s328_s3, 384 }
  0xf0   :  { %p261_p5 = scmp.ne.s32.totalorder %s328_s3, %s260_s24  ;;  %p264_p6 = scmp.lt.u32.totalorder %s260_s24, %s328_s3 }
  0xf2   :  { %p266_p7 = pnand %p264_p6, %p261_p5 }
  0xf4   :  { %269 = shalt.err (!%p266_p7)
}
  0xf5   :  { %s276_s29 = smov 64   ;;  %s277_s30 = smov 4  }
  0xf6   :  { %178 = dma.vmem_to_hbm [thread:$0]  %s173_s2, 384, %s328_s3, [#allocation3], %s276_s29, %s276_s29, %s277_s30  }
  0xf7   :  { %270 = dma.done.wait [#allocation3], 384  }
  0xf8   :  { %271 = vsyncadd [#allocation3], 4294966912 }
  0xf9   :  { %182 = vsyncpa [#allocation3], 1 }

</bundles_post_ra>
